<compile_context>
chip_gen: v7x
topology: tpu7x:2x2x1
jax: 0.10.0
libtpu: 0.0.40
codegen_flags: <defaults>
</compile_context>

<pallas_src>
import functools

import jax
import jax.numpy as jnp
from jax.experimental import pallas as pl
from jax.experimental.pallas import tpu as pltpu

EPS = 1e-5

_SWEET_BYTES = 2 * 1024 * 1024     # ~2 MiB blocks: near the HBM-roofline sweet spot
_VMEM_BUDGET = 36 * 1024 * 1024    # block-sizing budget (v7x has only 64 MiB VMEM/TC)
_VMEM_LIMIT = 48 * 1024 * 1024     # scoped-VMEM limit handed to Mosaic


def _round_up(v, m):
    return -(-v // m) * m


def _pick_c_tile(c, row_bytes, n_slabs):
    """Channel-tile size for blocks of shape (..., c_tile, M).

    row_bytes: bytes of one channel row of a slab block (N*M*4 or M*4).
    n_slabs:   number of slab-sized arrays moved per grid step (x[, y, out]);
               each is double-buffered by the Pallas pipeline.
    Returns 0 if not even an 8-channel tile fits the VMEM budget.
    """
    if c <= 8:
        return c if 2 * n_slabs * c * row_bytes <= _VMEM_BUDGET else 0
    max_ct = (_VMEM_BUDGET // (2 * n_slabs * row_bytes)) // 8 * 8
    if max_ct < 8:
        return 0
    # ~2 MiB per x block, but keep >= 2 channel tiles for megacore sharding.
    want = min(max(8, _SWEET_BYTES // row_bytes), -(-c // 2))
    return min(max_ct, _round_up(want, 8), c)


def _mosaic_params(*semantics):
    return pltpu.CompilerParams(dimension_semantics=semantics,
                                vmem_limit_bytes=_VMEM_LIMIT)


def _fused_bn_add_relu_kernel(x_ref, y_ref, g_ref, b_ref, o_ref, *, inv_count):
    # x_ref / y_ref / o_ref: (N, c_tile, M);  g_ref / b_ref: (c_tile, 1).
    x = x_ref[...]
    # Per-channel batch statistics over (N, M).  Two-pass (mean, then centered
    # second moment) for numerical stability; x is VMEM resident so the second
    # pass costs only VPU cycles, hidden under the DMA.
    mean = jnp.sum(jnp.sum(x, axis=2, keepdims=True), axis=0, keepdims=True)
    mean = mean * inv_count                                     # (1, c_tile, 1)
    xc = x - mean
    var = jnp.sum(jnp.sum(xc * xc, axis=2, keepdims=True), axis=0, keepdims=True)
    var = var * inv_count                                       # biased, as PyTorch BN
    scale = g_ref[...][None, :, :] * jax.lax.rsqrt(var + EPS)   # gamma / sqrt(var+eps)
    bias = b_ref[...][None, :, :]
    # Fused normalize + residual add + ReLU.  Ragged (padded) channel rows of
    # the last tile produce garbage here, but their output rows are dropped by
    # the partial writeback, so they never contaminate valid channels.
    o_ref[...] = jnp.maximum(y_ref[...] + xc * scale + bias, 0.0)


def _stats_kernel(x_ref, g_ref, b_ref, scale_ref, bias_ref, *, inv_count):
    # Fallback phase 1.  grid = (c_tiles, N); N (axis 1) is the reduction axis.
    # scale_ref accumulates sum(x), bias_ref accumulates sum(x*x); in the last
    # reduction step they are rewritten in place as the folded affine params.
    ni = pl.program_id(1)

    @pl.when(ni == 0)
    def _init():
        scale_ref[...] = jnp.zeros_like(scale_ref)
        bias_ref[...] = jnp.zeros_like(bias_ref)

    x = x_ref[...]                                           # (c_tile, M)
    scale_ref[...] += jnp.sum(x, axis=1, keepdims=True)      # running sum
    bias_ref[...] += jnp.sum(x * x, axis=1, keepdims=True)   # running sum of squares

    @pl.when(ni == pl.num_programs(1) - 1)
    def _finalize():
        mean = scale_ref[...] * inv_count
        # E[x^2] - E[x]^2 (biased variance, as PyTorch BN normalization); the
        # clamp guards against tiny negative values from cancellation.
        var = jnp.maximum(bias_ref[...] * inv_count - mean * mean, 0.0)
        scale = g_ref[...] * jax.lax.rsqrt(var + EPS)
        scale_ref[...] = scale
        bias_ref[...] = b_ref[...] - mean * scale


def _apply_kernel(x_ref, y_ref, scale_ref, bias_ref, o_ref, *, c_tile):
    # Fallback phase 2: relu(y + x*scale + bias).  scale/bias live untiled in
    # VMEM (constant index_map => no per-step DMA); slice this tile's rows.
    off = pl.multiple_of(pl.program_id(1) * c_tile, 8)
    scale = scale_ref[pl.ds(off, c_tile), :]                 # (c_tile, 1)
    bias = bias_ref[pl.ds(off, c_tile), :]
    o_ref[...] = jnp.maximum(y_ref[...] + x_ref[...] * scale + bias, 0.0)


def bn_add_relu(x34, x21, gamma, beta, *, force_two_pass=False):
    """relu(x21 + BatchNorm2d(x34)) with training-mode batch statistics.

    x34, x21: (N, C, H, W) float32 (NCHW, matching the PyTorch module).
    gamma, beta: (C,) float32.
    """
    n, c, h, w = x34.shape
    m = h * w
    # Contiguous collapse of H,W -- a view-style reshape, no transpose.
    # TODO(synk): for tiny feature maps (H*W < 128) the lane axis could be made
    # dense by packing 128//(H*W) channels per lane row; not needed for the
    # module's 56x56 maps.
    x = x34.reshape(n, c, m).astype(jnp.float32)
    y = x21.reshape(n, c, m).astype(jnp.float32)
    inv_count = 1.0 / float(n * m)

    ct_fused = 0 if force_two_pass else _pick_c_tile(c, n * m * 4, 3)

    if ct_fused > 0:
        # ---- Single fused pass: stats + normalize + add + relu per tile. ----
        c_tiles = pl.cdiv(c, ct_fused)
        c_pad = c_tiles * ct_fused
        g = jnp.pad(gamma.astype(jnp.float32), (0, c_pad - c),
                    constant_values=1.0).reshape(c_pad, 1)
        b = jnp.pad(beta.astype(jnp.float32), (0, c_pad - c)).reshape(c_pad, 1)
        out = pl.pallas_call(
            functools.partial(_fused_bn_add_relu_kernel, inv_count=inv_count),
            grid=(c_tiles,),
            in_specs=[
                pl.BlockSpec((n, ct_fused, m), lambda ci: (0, ci, 0)),
                pl.BlockSpec((n, ct_fused, m), lambda ci: (0, ci, 0)),
                pl.BlockSpec((ct_fused, 1), lambda ci: (ci, 0)),
                pl.BlockSpec((ct_fused, 1), lambda ci: (ci, 0)),
            ],
            out_specs=pl.BlockSpec((n, ct_fused, m), lambda ci: (0, ci, 0)),
            out_shape=jax.ShapeDtypeStruct((n, c, m), jnp.float32),
            compiler_params=_mosaic_params("parallel"),
        )(x, y, g, b)
        return out.reshape(n, c, h, w)

    # ---- Fallback: two passes, for N*H*W slabs too large for fused VMEM. ----
    ct = _pick_c_tile(c, m * 4, 3)
    # TODO(synk): for absurdly large H*W (> ~180K elements per image) the
    # reduction would also need spatial tiling with masking of the ragged tail.
    assert ct > 0, "spatial extent too large for the two-pass fallback tiling"
    c_tiles = pl.cdiv(c, ct)
    c_pad = c_tiles * ct
    g = jnp.pad(gamma.astype(jnp.float32), (0, c_pad - c),
                constant_values=1.0).reshape(c_pad, 1)
    b = jnp.pad(beta.astype(jnp.float32), (0, c_pad - c)).reshape(c_pad, 1)

    # Phase 1: per-channel sums reduced over the batch grid axis, folded into
    # (scale, bias) = (gamma/sqrt(var+eps), beta - mean*scale) at finalize.
    scale, bias = pl.pallas_call(
        functools.partial(_stats_kernel, inv_count=inv_count),
        grid=(c_tiles, n),
        in_specs=[
            pl.BlockSpec((None, ct, m), lambda ci, ni: (ni, ci, 0)),
            pl.BlockSpec((ct, 1), lambda ci, ni: (ci, 0)),
            pl.BlockSpec((ct, 1), lambda ci, ni: (ci, 0)),
        ],
        out_specs=(
            pl.BlockSpec((ct, 1), lambda ci, ni: (ci, 0)),
            pl.BlockSpec((ct, 1), lambda ci, ni: (ci, 0)),
        ),
        out_shape=(
            jax.ShapeDtypeStruct((c_pad, 1), jnp.float32),
            jax.ShapeDtypeStruct((c_pad, 1), jnp.float32),
        ),
        compiler_params=_mosaic_params("parallel", "arbitrary"),
    )(x, g, b)

    # Phase 2: fused scale/bias + residual add + ReLU; scale/bias untiled.
    out = pl.pallas_call(
        functools.partial(_apply_kernel, c_tile=ct),
        grid=(n, c_tiles),
        in_specs=[
            pl.BlockSpec((None, ct, m), lambda ni, ci: (ni, ci, 0)),
            pl.BlockSpec((None, ct, m), lambda ni, ci: (ni, ci, 0)),
            pl.BlockSpec((c_pad, 1), lambda ni, ci: (0, 0)),
            pl.BlockSpec((c_pad, 1), lambda ni, ci: (0, 0)),
        ],
        out_specs=pl.BlockSpec((None, ct, m), lambda ni, ci: (ni, ci, 0)),
        out_shape=jax.ShapeDtypeStruct((n, c, m), jnp.float32),
        compiler_params=_mosaic_params("parallel", "parallel"),
    )(x, y, scale, bias)
    return out.reshape(n, c, h, w)


def _reference(x34, x21, gamma, beta):
    mean = jnp.mean(x34, axis=(0, 2, 3), keepdims=True)
    var = jnp.mean(jnp.square(x34 - mean), axis=(0, 2, 3), keepdims=True)
    xn = (x34 - mean) / jnp.sqrt(var + EPS)
    xn = xn * gamma.reshape(1, -1, 1, 1) + beta.reshape(1, -1, 1, 1)
    return jnp.maximum(x21 + xn, 0.0)


if __name__ == "__main__":
    # TODO(synk): running_mean / running_var momentum buffer updates are
    # training-state side effects of the PyTorch module and are not produced
    # here; the returned tensor uses batch statistics exactly as the forward.
    key = jax.random.PRNGKey(0)

    # Small shapes consistent with the module (NCHW, BN over the channel axis):
    #  - (1, 232, 14, 14): real channel count -> C tiling + ragged channel edge.
    #  - (2, 16, 16, 16):  exercises the batch reduction in the fused path.
    #  - (2, 16, 16, 16) with force_two_pass: validates the fallback path.
    #  - (1, 8, 8, 8):     tiny full-extent channel block.
    cases = [
        ((1, 232, 14, 14), False),
        ((2, 16, 16, 16), False),
        ((2, 16, 16, 16), True),
        ((1, 8, 8, 8), False),
    ]
    for (N, C, H, W), two_pass in cases:
        key, k1, k2, k3, k4 = jax.random.split(key, 5)
        x34 = jax.random.normal(k1, (N, C, H, W), dtype=jnp.float32)
        x21 = jax.random.normal(k2, (N, C, H, W), dtype=jnp.float32)
        gamma = 1.0 + 0.1 * jax.random.normal(k3, (C,), dtype=jnp.float32)
        beta = 0.1 * jax.random.normal(k4, (C,), dtype=jnp.float32)

        out = jax.block_until_ready(
            bn_add_relu(x34, x21, gamma, beta, force_two_pass=two_pass))
        ref = _reference(x34, x21, gamma, beta)
        assert out.shape == (N, C, H, W)
        assert jnp.allclose(out, ref, atol=1e-4, rtol=1e-4), ((N, C, H, W), two_pass)

    print("KERNEL_OK")
</pallas_src>

<mosaic_0001>
module attributes {stable_mosaic.version = 11 : i64} {
  func.func @_fused_bn_add_relu_kernel(%arg0: i32, %arg1: memref<1x120x196xf32, #tpu.memory_space<vmem>>, %arg2: memref<1x120x196xf32, #tpu.memory_space<vmem>>, %arg3: memref<120x1xf32, #tpu.memory_space<vmem>>, %arg4: memref<120x1xf32, #tpu.memory_space<vmem>>, %arg5: memref<1x120x196xf32, #tpu.memory_space<vmem>>) attributes {dimension_semantics = [#tpu.dimension_semantics<parallel>], iteration_bounds = array<i64: 2>, scalar_prefetch = 0 : i64, scratch_operands = 0 : i64, tpu.core_type = #tpu.core_type<tc>, window_params = [{transform_indices = @transform_0, window_bounds = array<i64: 1, 120, 196>}, {transform_indices = @transform_1, window_bounds = array<i64: 1, 120, 196>}, {transform_indices = @transform_2, window_bounds = array<i64: 120, 1>}, {transform_indices = @transform_3, window_bounds = array<i64: 120, 1>}, {transform_indices = @transform_4, window_bounds = array<i64: 1, 120, 196>}]} {
    %c0 = arith.constant 0 : index
    %c0_0 = arith.constant 0 : index
    %c0_1 = arith.constant 0 : index
    %0 = vector.load %arg1[%c0, %c0_0, %c0_1] : memref<1x120x196xf32, #tpu.memory_space<vmem>>, vector<1x120x196xf32>
    %cst = arith.constant dense<0.000000e+00> : vector<1x120xf32>
    %1 = vector.multi_reduction <add>, %0, %cst [2] : vector<1x120x196xf32> to vector<1x120xf32>
    %2 = vector.shape_cast %1 : vector<1x120xf32> to vector<1x120x1xf32>
    %cst_2 = arith.constant dense<0.000000e+00> : vector<120x1xf32>
    %3 = vector.multi_reduction <add>, %2, %cst_2 [0] : vector<1x120x1xf32> to vector<120x1xf32>
    %4 = vector.shape_cast %3 : vector<120x1xf32> to vector<1x120x1xf32>
    %cst_3 = arith.constant 0.00510204071 : f32
    %5 = vector.broadcast %cst_3 : f32 to vector<1x120x1xf32>
    %6 = arith.mulf %4, %5 : vector<1x120x1xf32>
    %7 = vector.broadcast %6 : vector<1x120x1xf32> to vector<1x120x196xf32>
    %8 = arith.subf %0, %7 : vector<1x120x196xf32>
    %9 = arith.mulf %8, %8 : vector<1x120x196xf32>
    %cst_4 = arith.constant dense<0.000000e+00> : vector<1x120xf32>
    %10 = vector.multi_reduction <add>, %9, %cst_4 [2] : vector<1x120x196xf32> to vector<1x120xf32>
    %11 = vector.shape_cast %10 : vector<1x120xf32> to vector<1x120x1xf32>
    %cst_5 = arith.constant dense<0.000000e+00> : vector<120x1xf32>
    %12 = vector.multi_reduction <add>, %11, %cst_5 [0] : vector<1x120x1xf32> to vector<120x1xf32>
    %13 = vector.shape_cast %12 : vector<120x1xf32> to vector<1x120x1xf32>
    %cst_6 = arith.constant 0.00510204071 : f32
    %14 = vector.broadcast %cst_6 : f32 to vector<1x120x1xf32>
    %15 = arith.mulf %13, %14 : vector<1x120x1xf32>
    %c0_7 = arith.constant 0 : index
    %c0_8 = arith.constant 0 : index
    %16 = vector.load %arg3[%c0_7, %c0_8] : memref<120x1xf32, #tpu.memory_space<vmem>>, vector<120x1xf32>
    %17 = vector.shape_cast %16 : vector<120x1xf32> to vector<1x120x1xf32>
    %cst_9 = arith.constant 9.99999974E-6 : f32
    %18 = vector.broadcast %cst_9 : f32 to vector<1x120x1xf32>
    %19 = arith.addf %15, %18 : vector<1x120x1xf32>
    %20 = math.rsqrt %19 : vector<1x120x1xf32>
    %21 = arith.mulf %17, %20 : vector<1x120x1xf32>
    %c0_10 = arith.constant 0 : index
    %c0_11 = arith.constant 0 : index
    %22 = vector.load %arg4[%c0_10, %c0_11] : memref<120x1xf32, #tpu.memory_space<vmem>>, vector<120x1xf32>
    %23 = vector.shape_cast %22 : vector<120x1xf32> to vector<1x120x1xf32>
    %c0_12 = arith.constant 0 : index
    %c0_13 = arith.constant 0 : index
    %c0_14 = arith.constant 0 : index
    %24 = vector.load %arg2[%c0_12, %c0_13, %c0_14] : memref<1x120x196xf32, #tpu.memory_space<vmem>>, vector<1x120x196xf32>
    %25 = vector.broadcast %21 : vector<1x120x1xf32> to vector<1x120x196xf32>
    %26 = arith.mulf %8, %25 : vector<1x120x196xf32>
    %27 = arith.addf %24, %26 : vector<1x120x196xf32>
    %28 = vector.broadcast %23 : vector<1x120x1xf32> to vector<1x120x196xf32>
    %29 = arith.addf %27, %28 : vector<1x120x196xf32>
    %cst_15 = arith.constant 0.000000e+00 : f32
    %30 = vector.broadcast %cst_15 : f32 to vector<1x120x196xf32>
    %31 = arith.maximumf %29, %30 : vector<1x120x196xf32>
    %c0_16 = arith.constant 0 : index
    %c0_17 = arith.constant 0 : index
    %c0_18 = arith.constant 0 : index
    %32 = vector.load %arg5[%c0_16, %c0_17, %c0_18] : memref<1x120x196xf32, #tpu.memory_space<vmem>>, vector<1x120x196xf32>
    tpu.vector_store %arg5[%c0_16, %c0_17, %c0_18], %31 {strides = array<i32>} : memref<1x120x196xf32, #tpu.memory_space<vmem>>, vector<1x120x196xf32>,
    return
  }
  func.func @transform_0(%arg0: i32) -> (i32, i32, i32) {
    %c0_i32 = arith.constant 0 : i32
    %c0_i32_0 = arith.constant 0 : i32
    %c0_i32_1 = arith.constant 0 : i32
    return %c0_i32, %arg0, %c0_i32_0 : i32, i32, i32
  }
  func.func @transform_1(%arg0: i32) -> (i32, i32, i32) {
    %c0_i32 = arith.constant 0 : i32
    %c0_i32_0 = arith.constant 0 : i32
    %c0_i32_1 = arith.constant 0 : i32
    return %c0_i32, %arg0, %c0_i32_0 : i32, i32, i32
  }
  func.func @transform_2(%arg0: i32) -> (i32, i32) {
    %c0_i32 = arith.constant 0 : i32
    %c0_i32_0 = arith.constant 0 : i32
    return %arg0, %c0_i32 : i32, i32
  }
  func.func @transform_3(%arg0: i32) -> (i32, i32) {
    %c0_i32 = arith.constant 0 : i32
    %c0_i32_0 = arith.constant 0 : i32
    return %arg0, %c0_i32 : i32, i32
  }
  func.func @transform_4(%arg0: i32) -> (i32, i32, i32) {
    %c0_i32 = arith.constant 0 : i32
    %c0_i32_0 = arith.constant 0 : i32
    %c0_i32_1 = arith.constant 0 : i32
    return %c0_i32, %arg0, %c0_i32_0 : i32, i32, i32
  }
}

</mosaic_0001>

<bundles_post_ra>
// kernel: tpu_custom_call.1
= control target key start
LH: loop header
LB: loop body
LE: loop exit
PB: predicated region body
PF: predicated region fallthrough
CT: control target
= control target key end

     0   :  { %s1522_s15 = smov 0   ;;  %s1524_s16 = smov 0   ;;  %s2205_s0 = inlined_call_operand.vmem [shape: f32[1,232,196], index: 0, kind: input, shape index: {}]   ;;  %s2206_s1 = inlined_call_operand.vmem [shape: f32[1,232,196], index: 1, kind: input, shape index: {}]   ;;  %s2207_s2 = inlined_call_operand.vmem [shape: f32[240,1], index: 2, kind: input, shape index: {}]   ;;  %s2208_s3 = inlined_call_operand.vmem [shape: f32[240,1], index: 3, kind: input, shape index: {}]   ;;  %s2209_s4 = inlined_call_operand.vmem [shape: f32[1,232,196], index: 4, kind: output, shape index: {}]  }
   0x1   :  { %s1526_s17 = smov 0  }
   0x2 LB: > { %s1535_s18 = sadd.s32 4294967295, %s1462_s17   ;;  %s1537_s19 = sadd.s32 1, %s1462_s17   ;;  %s1462_s17 = sphi %s1526_s17, %s2218_s17   ;;  %s1458_s16 = sphi %s1524_s16, %s2217_s16   ;;  %s1454_s15 = sphi %s1522_s15, %s2216_s15  }
   0x3   : > { %s122_s20 = ssub.s32 %s1462_s17, %s1537_s19  ;;  %s125_s21 = sadd.s32 1, %s1458_s16 }
   0x4   : > { %p123_p0 = scmp.eq.s32.totalorder %s122_s20, 0  ;;  %p135_p1 = scmp.ne.s32.totalorder %s1458_s16, %s1454_s15 }
   0x5   : > { %p136_p2 = scmp.eq.s32.totalorder %s1535_s18, 1  ;;  %p1254_p3 = scmp.ge.s32.totalorder %s1462_s17, 1 }
   0x6   : > { %s1545_s22 = scalar_select %p123_p0, %s1458_s16, %s125_s21  }
   0x7   : > { %p1547_p4 = por %p136_p2, %p135_p1  ;;  %p218_p5 = scmp.lt.s32.totalorder %s1462_s17, 3 }
   0x9   : > { %p219_p6 = pnand %p1254_p3, %p218_p5 }
   0xa   : > { %s1552_s24 = smul.u32 (!%p219_p6), 15, %s1535_s18  ;;  %vm352_vm0 = vcmask (!%p219_p6), 556032   ;;  %v1496_v60 = vmov (!%p219_p6), 0   ;;  %s267_s17 = sand.u32 (!%p219_p6), 1, %s1454_s15  }
   0xb   : > { %222 = sbr.rel (%p219_p6) target bundleno = 622 (0x26e), region = 36  ;;  %1373 = vset.pattern.permute.xlu1 (!%p219_p6), %v1496_v60  ;;  %1372 = vset.pattern.permute.xlu0 (!%p219_p6), %v1496_v60 }
   0xc   : > { %p276_p7 = scmp.lt.s32.totalorder (!%p219_p6), %s1552_s24, 28  ;;  %p305_p8 = scmp.lt.s32.totalorder (!%p219_p6), %s1552_s24, 29 }
   0xd   : > { %s1281_s20 = smul.u32 (!%p219_p6), 240, %s267_s17 }
   0xf   : > { %s1951_s15 = scalar_lea.vmem (!%p219_p6), [#allocation2], %s1281_s20  }
  0x12   : > { %s1556_s25 = scalar_select %p276_p7, %s1552_s24, 28 }
  0x13   : > { %s1857_s30 = scalar_select %p305_p8, %s1552_s24, 29 }
  0x14   : > { %s1275_s26 = sshll.u32 %s1556_s25, 4  ;;  %s1006_s21 = ssub.s32 (%p1547_p4), 29, %s1552_s24 }
  0x15   : > { %s1564_s29 = scalar_lea.vmem %s2205_s0, %s1275_s26  ;;  %s1259_s5 = sshll.u32 %s1857_s30, 3 }
  0x16   : > { %v1567_v0 = vld [vmem:[%s1564_s29] sm:$0xff]  ;;  %v1570_v1 = vld [vmem:[%s1564_s29 + $0x8] sm:$0xff]  ;;  %v1581_v5 = vld [vmem:[%s1564_s29 + $0x10] sm:$0xff]  ;;  %s1865_s8 = scalar_lea.vmem %s2208_s3, %s1259_s5  ;;  %s1896_s11 = scalar_lea.vmem %s2207_s2, %s1259_s5 }
  0x17   : > { %v1573_v2 = vld [vmem:[%s1564_s29 + $0x20] sm:$0xff]  ;;  %v353_v3 = vsel %vm352_vm0, %v1570_v1, 0.0  ;;  %v1578_v4 = vld [vmem:[%s1564_s29 + $0x28] sm:$0xff]  ;;  %v1584_v6 = vld [vmem:[%s1564_s29 + $0x18] sm:$0xff]  ;;  %s1938_s14 = scalar_lea.vmem %s2206_s1, %s1275_s26  ;;  %s1280_s25 = smul.u32 (%p1547_p4), 240, %s1535_s18 }
  0x18   : > { %v354_v7 = vadd.f32 %v353_v3, %v1567_v0  ;;  %v361_v8 = vsel %vm352_vm0, %v1578_v4, 0.0  ;;  %v357_v9 = vsel %vm352_vm0, %v1584_v6, 0.0  ;;  %v1592_v10 = vld [vmem:[%s1564_s29 + $0x30] sm:$0xff]  ;;  %v1595_v11 = vld [vmem:[%s1564_s29 + $0x38] sm:$0xff]  ;;  %v1601_v14 = vld [vmem:[%s1564_s29 + $0x48] sm:$0xff]  ;;  %p1007_p9 = scmp.lt.s32.totalorder (%p1547_p4), %s1006_s21, 15 }
  0x19   : > { %v362_v12 = vadd.f32 %v361_v8, %v1573_v2  ;;  %v365_v13 = vsel %vm352_vm0, %v1595_v11, 0.0  ;;  %v1604_v15 = vld [vmem:[%s1564_s29 + $0x58] sm:$0xff]  ;;  %v358_v16 = vadd.f32 %v357_v9, %v1581_v5  ;;  %v1609_v18 = vld [vmem:[%s1564_s29 + $0x40] sm:$0xff]  ;;  %v369_v19 = vsel %vm352_vm0, %v1601_v14, 0.0  ;;  %v1614_v20 = vld [vmem:[%s1564_s29 + $0x50] sm:$0xff]  ;;  %s2077_s28 = scalar_lea.vmem (%p1547_p4), %s2209_s4, %s1280_s25  }
  0x1a   : > { %355 = vadd.xlane.f32.xlu0 %v354_v7  ;;  %v366_v17 = vadd.f32 %v365_v13, %v1592_v10  ;;  %v373_v21 = vsel %vm352_vm0, %v1604_v15, 0.0  ;;  %v1619_v22 = vld [vmem:[%s1564_s29 + $0x68] sm:$0xff]  ;;  %v1622_v23 = vld [vmem:[%s1564_s29 + $0x78] sm:$0xff]  ;;  %v370_v24 = vadd.f32 %v369_v19, %v1609_v18  ;;  %v1627_v26 = vld [vmem:[%s1564_s29 + $0x60] sm:$0xff] }
  0x1b   : > { %363 = vadd.xlane.f32.xlu1 %v362_v12  ;;  %v374_v25 = vadd.f32 %v373_v21, %v1614_v20  ;;  %v377_v27 = vsel %vm352_vm0, %v1619_v22, 0.0  ;;  %v1632_v28 = vld [vmem:[%s1564_s29 + $0x70] sm:$0xff]  ;;  %v381_v29 = vsel %vm352_vm0, %v1622_v23, 0.0  ;;  %v1637_v30 = vld [vmem:[%s1564_s29 + $0x88] sm:$0xff]  ;;  %v1640_v31 = vld [vmem:[%s1564_s29 + $0x98] sm:$0xff] }
  0x1c   : > { %v378_v32 = vadd.f32 %v377_v27, %v1627_v26  ;;  %v382_v33 = vadd.f32 %v381_v29, %v1632_v28  ;;  %v1645_v34 = vld [vmem:[%s1564_s29 + $0x80] sm:$0xff]  ;;  %v385_v35 = vsel %vm352_vm0, %v1637_v30, 0.0  ;;  %v1650_v36 = vld [vmem:[%s1564_s29 + $0x90] sm:$0xff]  ;;  %v389_v37 = vsel %vm352_vm0, %v1640_v31, 0.0  ;;  %v1655_v38 = vld [vmem:[%s1564_s29 + $0xa8] sm:$0xff] }
  0x1d   : > { %v1658_v39 = vld [vmem:[%s1564_s29 + $0xb8] sm:$0xff]  ;;  %v386_v40 = vadd.f32 %v385_v35, %v1645_v34  ;;  %v390_v41 = vadd.f32 %v389_v37, %v1650_v36  ;;  %v1663_v42 = vld [vmem:[%s1564_s29 + $0xa0] sm:$0xff]  ;;  %v393_v43 = vsel %vm352_vm0, %v1655_v38, 0.0  ;;  %v1668_v44 = vld [vmem:[%s1564_s29 + $0xb0] sm:$0xff] }
  0x1e   : > { %359 = vadd.xlane.f32.xlu0 %v358_v16  ;;  %v397_v45 = vsel %vm352_vm0, %v1658_v39, 0.0  ;;  %v1673_v46 = vld [vmem:[%s1564_s29 + $0xc8] sm:$0xff]  ;;  %v1676_v47 = vld [vmem:[%s1564_s29 + $0xd8] sm:$0xff]  ;;  %v394_v48 = vadd.f32 %v393_v43, %v1663_v42  ;;  %v1681_v50 = vld [vmem:[%s1564_s29 + $0xc0] sm:$0xff] }
  0x1f   : > { %367 = vadd.xlane.f32.xlu1 %v366_v17  ;;  %v398_v49 = vadd.f32 %v397_v45, %v1668_v44  ;;  %v401_v51 = vsel %vm352_vm0, %v1673_v46, 0.0  ;;  %v1686_v52 = vld [vmem:[%s1564_s29 + $0xd0] sm:$0xff]  ;;  %v405_v53 = vsel %vm352_vm0, %v1676_v47, 0.0  ;;  %v1691_v54 = vld [vmem:[%s1564_s29 + $0xe8] sm:$0xff]  ;;  %v1696_v57 = vld [vmem:[%s1564_s29 + $0xe0] sm:$0xff] }
  0x20   : > { %v402_v55 = vadd.f32 %v401_v51, %v1681_v50  ;;  %v406_v56 = vadd.f32 %v405_v53, %v1686_v52  ;;  %v409_v58 = vsel %vm352_vm0, %v1691_v54, 0.0 }
  0x21   : > { %v410_v59 = vadd.f32 %v409_v58, %v1696_v57 }
  0x22   : > { %371 = vadd.xlane.f32.xlu0 %v370_v24 }
  0x23   : > { %375 = vadd.xlane.f32.xlu1 %v374_v25 }
  0x26   : > { %379 = vadd.xlane.f32.xlu0 %v378_v32 }
  0x27   : > { %383 = vadd.xlane.f32.xlu1 %v382_v33 }
  0x2a   : > { %387 = vadd.xlane.f32.xlu0 %v386_v40 }
  0x2b   : > { %391 = vadd.xlane.f32.xlu1 %v390_v41 }
  0x2e   : > { %395 = vadd.xlane.f32.xlu0 %v394_v48 }
  0x2f   : > { %399 = vadd.xlane.f32.xlu1 %v398_v49 }
  0x32   : > { %403 = vadd.xlane.f32.xlu0 %v402_v55 }
  0x33   : > { %407 = vadd.xlane.f32.xlu1 %v406_v56 }
  0x36   : > { %411 = vadd.xlane.f32.xlu0 %v410_v59 }
  0xa7   : > { %v356_v61 = vpop.xlane.xlu0 %355 }
  0xa8   : > { %v428_v62 = vmul.f32 0.0051020407, %v356_v61  ;;  %v364_v63 = vpop.xlane.xlu1 %363 }
  0xa9   : > { %v430_v3 = vmul.f32 0.0051020407, %v364_v63 }
  0xaa   : > { %v1702_v7 = vsub.f32 %v1567_v0, %v428_v62  ;;  %v1705_v8 = vsub.f32 %v1570_v1, %v428_v62 }
  0xab   : > { %v1708_v9 = vsub.f32 %v1573_v2, %v430_v3  ;;  %v1711_v12 = vsub.f32 %v1578_v4, %v430_v3  ;;  %v360_v13 = vpop.xlane.xlu0 %359 }
  0xac   : > { %v429_v16 = vmul.f32 0.0051020407, %v360_v13  ;;  %v368_v17 = vpop.xlane.xlu1 %367  ;;  %v473_v19 = vmul.f32 %v1702_v7, %v1702_v7  ;;  %v474_v21 = vmul.f32 %v1705_v8, %v1705_v8 }
  0xad   : > { %v431_v0 = vmul.f32 0.0051020407, %v368_v17  ;;  %v477_v1 = vmul.f32 %v1708_v9, %v1708_v9  ;;  %v478_v2 = vmul.f32 %v1711_v12, %v1711_v12 }
  0xae   : > { %v1722_v24 = vsub.f32 %v1581_v5, %v429_v16  ;;  %v1725_v4 = vsub.f32 %v1584_v6, %v429_v16  ;;  %v503_v25 = vsel %vm352_vm0, %v474_v21, 0.0 }
  0xaf   : > { %v1729_v27 = vsub.f32 %v1592_v10, %v431_v0  ;;  %v1732_v29 = vsub.f32 %v1595_v11, %v431_v0  ;;  %v372_v32 = vpop.xlane.xlu0 %371  ;;  %v504_v33 = vadd.f32 %v503_v25, %v473_v19  ;;  %v511_v35 = vsel %vm352_vm0, %v478_v2, 0.0 }
  0xb0   : > { %v432_v37 = vmul.f32 0.0051020407, %v372_v32  ;;  %v376_v40 = vpop.xlane.xlu1 %375  ;;  %v475_v5 = vmul.f32 %v1722_v24, %v1722_v24  ;;  %v476_v6 = vmul.f32 %v1725_v4, %v1725_v4  ;;  %v512_v43 = vadd.f32 %v511_v35, %v477_v1 }
  0xb1   : > { %505 = vadd.xlane.f32.xlu1 %v504_v33  ;;  %v433_v41 = vmul.f32 0.0051020407, %v376_v40  ;;  %v479_v10 = vmul.f32 %v1729_v27, %v1729_v27  ;;  %v480_v11 = vmul.f32 %v1732_v29, %v1732_v29 }
  0xb2   : > { %v1744_v45 = vsub.f32 %v1609_v18, %v432_v37  ;;  %v1747_v48 = vsub.f32 %v1601_v14, %v432_v37  ;;  %v507_v49 = vsel %vm352_vm0, %v476_v6, 0.0 }
  0xb3   : > { %v1751_v51 = vsub.f32 %v1614_v20, %v433_v41  ;;  %v1754_v53 = vsub.f32 %v1604_v15, %v433_v41  ;;  %v380_v55 = vpop.xlane.xlu0 %379  ;;  %v508_v56 = vadd.f32 %v507_v49, %v475_v5  ;;  %v515_v58 = vsel %vm352_vm0, %v480_v11, 0.0 }
  0xb4   : > { %v434_v59 = vmul.f32 0.0051020407, %v380_v55  ;;  %v384_v60 = vpop.xlane.xlu1 %383  ;;  %v481_v18 = vmul.f32 %v1744_v45, %v1744_v45  ;;  %v482_v14 = vmul.f32 %v1747_v48, %v1747_v48  ;;  %v516_v20 = vadd.f32 %v515_v58, %v479_v10 }
  0xb5   : > { %513 = vadd.xlane.f32.xlu1 %v512_v43  ;;  %509 = vadd.xlane.f32.xlu0 %v508_v56  ;;  %v435_v61 = vmul.f32 0.0051020407, %v384_v60  ;;  %v483_v15 = vmul.f32 %v1751_v51, %v1751_v51  ;;  %v484_v62 = vmul.f32 %v1754_v53, %v1754_v53 }
  0xb6   : > { %v1766_v63 = vsub.f32 %v1627_v26, %v434_v59  ;;  %v1769_v3 = vsub.f32 %v1619_v22, %v434_v59  ;;  %v519_v13 = vsel %vm352_vm0, %v482_v14, 0.0 }
  0xb7   : > { %v1773_v16 = vsub.f32 %v1632_v28, %v435_v61  ;;  %v1776_v17 = vsub.f32 %v1622_v23, %v435_v61  ;;  %v388_v19 = vpop.xlane.xlu0 %387  ;;  %v520_v21 = vadd.f32 %v519_v13, %v481_v18  ;;  %v523_v0 = vsel %vm352_vm0, %v484_v62, 0.0 }
  0xb8   : > { %v436_v1 = vmul.f32 0.0051020407, %v388_v19  ;;  %v392_v2 = vpop.xlane.xlu1 %391  ;;  %v485_v26 = vmul.f32 %v1766_v63, %v1766_v63  ;;  %v486_v22 = vmul.f32 %v1769_v3, %v1769_v3  ;;  %v524_v28 = vadd.f32 %v523_v0, %v483_v15 }
  0xb9   : > { %517 = vadd.xlane.f32.xlu0 %v516_v20  ;;  %521 = vadd.xlane.f32.xlu1 %v520_v21  ;;  %v437_v25 = vmul.f32 0.0051020407, %v392_v2  ;;  %v487_v23 = vmul.f32 %v1773_v16, %v1773_v16  ;;  %v488_v32 = vmul.f32 %v1776_v17, %v1776_v17 }
  0xba   : > { %v1788_v33 = vsub.f32 %v1645_v34, %v436_v1  ;;  %v1791_v35 = vsub.f32 %v1637_v30, %v436_v1  ;;  %v527_v37 = vsel %vm352_vm0, %v486_v22, 0.0 }
  0xbb   : > { %v1795_v40 = vsub.f32 %v1650_v36, %v437_v25  ;;  %v1798_v5 = vsub.f32 %v1640_v31, %v437_v25  ;;  %v396_v6 = vpop.xlane.xlu0 %395  ;;  %v528_v41 = vadd.f32 %v527_v37, %v485_v26  ;;  %v531_v43 = vsel %vm352_vm0, %v488_v32, 0.0 }
  0xbc   : > { %v438_v10 = vmul.f32 0.0051020407, %v396_v6  ;;  %v400_v11 = vpop.xlane.xlu1 %399  ;;  %v489_v34 = vmul.f32 %v1788_v33, %v1788_v33  ;;  %v490_v30 = vmul.f32 %v1791_v35, %v1791_v35  ;;  %v532_v36 = vadd.f32 %v531_v43, %v487_v23  ;;  %v656_v43 = vld [vmem:[%s1865_s8 + $0x18] sm:$0xff] }
  0xbd   : > { %525 = vadd.xlane.f32.xlu0 %v524_v28  ;;  %529 = vadd.xlane.f32.xlu1 %v528_v41  ;;  %v439_v49 = vmul.f32 0.0051020407, %v400_v11  ;;  %v491_v31 = vmul.f32 %v1795_v40, %v1795_v40  ;;  %v492_v55 = vmul.f32 %v1798_v5, %v1798_v5  ;;  %v654_v41 = vld [vmem:[%s1865_s8 + $0x8] sm:$0xff]  ;;  %v655_v11 = vld [vmem:[%s1865_s8 + $0x10] sm:$0xff] }
  0xbe   : > { %v1810_v56 = vsub.f32 %v1663_v42, %v438_v10  ;;  %v1813_v58 = vsub.f32 %v1655_v38, %v438_v10  ;;  %v535_v59 = vsel %vm352_vm0, %v490_v30, 0.0  ;;  %v653_v10 = vld [vmem:[%s1865_s8] sm:$0xff] }
  0xbf   : > { %v1817_v60 = vsub.f32 %v1668_v44, %v439_v49  ;;  %v1820_v18 = vsub.f32 %v1658_v39, %v439_v49  ;;  %v404_v14 = vpop.xlane.xlu0 %403  ;;  %v536_v61 = vadd.f32 %v535_v59, %v489_v34  ;;  %v539_v20 = vsel %vm352_vm0, %v492_v55, 0.0  ;;  %v657_v34 = vld [vmem:[%s1865_s8 + $0x20] sm:$0xff]  ;;  %v659_v49 = vld [vmem:[%s1865_s8 + $0x30] sm:$0xff] }
  0xc0   : > { %v440_v15 = vmul.f32 0.0051020407, %v404_v14  ;;  %v408_v62 = vpop.xlane.xlu1 %407  ;;  %v493_v42 = vmul.f32 %v1810_v56, %v1810_v56  ;;  %v494_v38 = vmul.f32 %v1813_v58, %v1813_v58  ;;  %v540_v44 = vadd.f32 %v539_v20, %v491_v31  ;;  %v661_v31 = vld [vmem:[%s1865_s8 + $0x40] sm:$0xff]  ;;  %v663_v59 = vld [vmem:[%s1865_s8 + $0x50] sm:$0xff] }
  0xc1   : > { %533 = vadd.xlane.f32.xlu0 %v532_v36  ;;  %537 = vadd.xlane.f32.xlu1 %v536_v61  ;;  %v441_v13 = vmul.f32 0.0051020407, %v408_v62  ;;  %v495_v39 = vmul.f32 %v1817_v60, %v1817_v60  ;;  %v496_v19 = vmul.f32 %v1820_v18, %v1820_v18  ;;  %v665_v20 = vld [vmem:[%s1865_s8 + $0x60] sm:$0xff] }
  0xc2   : > { %v1832_v21 = vsub.f32 %v1681_v50, %v440_v15  ;;  %v1835_v0 = vsub.f32 %v1673_v46, %v440_v15  ;;  %v543_v1 = vsel %vm352_vm0, %v494_v38, 0.0  ;;  %v660_v38 = vld [vmem:[%s1865_s8 + $0x38] sm:$0xff] }
  0xc3   : > { %v1839_v2 = vsub.f32 %v1686_v52, %v441_v13  ;;  %v1842_v26 = vsub.f32 %v1676_v47, %v441_v13  ;;  %v544_v22 = vadd.f32 %v543_v1, %v493_v42  ;;  %v547_v25 = vsel %vm352_vm0, %v496_v19, 0.0  ;;  %v412_v30 = vpop.xlane.xlu0 %411  ;;  %v658_v42 = vld [vmem:[%s1865_s8 + $0x28] sm:$0xff] }
  0xc4   : > { %v497_v50 = vmul.f32 %v1832_v21, %v1832_v21  ;;  %v498_v46 = vmul.f32 %v1835_v0, %v1835_v0  ;;  %v548_v28 = vadd.f32 %v547_v25, %v495_v39  ;;  %v442_v36 = vmul.f32 0.0051020407, %v412_v30  ;;  %v662_v13 = vld [vmem:[%s1865_s8 + $0x48] sm:$0xff] }
  0xc5   : > { %541 = vadd.xlane.f32.xlu0 %v540_v44  ;;  %545 = vadd.xlane.f32.xlu1 %v544_v22  ;;  %v499_v52 = vmul.f32 %v1839_v2, %v1839_v2  ;;  %v500_v47 = vmul.f32 %v1842_v26, %v1842_v26 }
  0xc6   : > { %v551_v23 = vsel %vm352_vm0, %v498_v46, 0.0  ;;  %v1875_v55 = vsub.f32 %v1691_v54, %v442_v36  ;;  %v1879_v14 = vsub.f32 %v1696_v57, %v442_v36  ;;  %v664_v57 = vld [vmem:[%s1865_s8 + $0x58] sm:$0xff] }
  0xc7   : > { %v552_v32 = vadd.f32 %v551_v23, %v497_v50  ;;  %v555_v37 = vsel %vm352_vm0, %v500_v47, 0.0 }
  0xc8   : > { %v556_v6 = vadd.f32 %v555_v37, %v499_v52  ;;  %v502_v61 = vmul.f32 %v1875_v55, %v1875_v55  ;;  %v501_v15 = vmul.f32 %v1879_v14, %v1879_v14 }
  0xc9   : > { %549 = vadd.xlane.f32.xlu0 %v548_v28  ;;  %553 = vadd.xlane.f32.xlu1 %v552_v32 }
  0xca   : > { %v559_v62 = vsel %vm352_vm0, %v502_v61, 0.0 }
  0xcb   : > { %v560_v54 = vadd.f32 %v559_v62, %v501_v15 }
  0xcd   : > { %557 = vadd.xlane.f32.xlu0 %v556_v6 }
  0xda   : > { %840 = vperm.xlu1 %1373, %v654_v41   ;;  %v593_v41 = vld [vmem:[%s1896_s11] sm:$0xff] }
  0xde   : > { %850 = vperm.xlu1 %1373, %v656_v43  }
  0xe3   : > { %835 = vperm.xlu0 %1372, %v653_v10  }
  0xe7   : > { %845 = vperm.xlu0 %1372, %v655_v11  }
  0xeb   : > { %855 = vperm.xlu0 %1372, %v657_v34  }
  0xef   : > { %865 = vperm.xlu0 %1372, %v659_v49  }
  0xf3   : > { %875 = vperm.xlu0 %1372, %v661_v31   ;;  %v594_v31 = vld [vmem:[%s1896_s11 + $0x8] sm:$0xff] }
  0xf7   : > { %885 = vperm.xlu0 %1372, %v663_v59  }
  0xfb   : > { %895 = vperm.xlu0 %1372, %v665_v20  }
 0x102   : > { %561 = vadd.xlane.f32.xlu1 %v560_v54 }
 0x113   : > { %860 = vperm.xlu1 %1373, %v658_v42  }
 0x117   : > { %870 = vperm.xlu1 %1373, %v660_v38  }
 0x11b   : > { %880 = vperm.xlu1 %1373, %v662_v13   ;;  %v595_v13 = vld [vmem:[%s1896_s11 + $0x10] sm:$0xff] }
 0x11f   : > { %890 = vperm.xlu1 %1373, %v664_v57  }
 0x13e   : > { %v506_v44 = vpop.xlane.xlu1 %505 }
 0x13f   : > { %v578_v39 = vmul.f32 0.0051020407, %v506_v44 }
 0x141   : > { %v608_v19 = vadd.f32 1e-05, %v578_v39 }
 0x142   : > { %v514_v1 = vpop.xlane.xlu1 %513  ;;  %v510_v22 = vpop.xlane.xlu0 %509 }
 0x143   : > { %1374 = vrsqrt.f32 %v608_v19  ;;  %v580_v25 = vmul.f32 0.0051020407, %v514_v1  ;;  %v579_v50 = vmul.f32 0.0051020407, %v510_v22  ;;  %v596_v1 = vld [vmem:[%s1896_s11 + $0x18] sm:$0xff] }
 0x145   : > { %v609_v46 = vadd.f32 1e-05, %v579_v50  ;;  %v610_v28 = vadd.f32 1e-05, %v580_v25 }
 0x146   : > { %v518_v52 = vpop.xlane.xlu0 %517  ;;  %v522_v47 = vpop.xlane.xlu1 %521 }
 0x147   : > { %v581_v23 = vmul.f32 0.0051020407, %v518_v52  ;;  %1376 = vrsqrt.f32 %v609_v46  ;;  %v582_v37 = vmul.f32 0.0051020407, %v522_v47 }
 0x148   : > { %1378 = vrsqrt.f32 %v610_v28 }
 0x149   : > { %v611_v32 = vadd.f32 1e-05, %v581_v23  ;;  %v612_v34 = vadd.f32 1e-05, %v582_v37 }
 0x14a   : > { %v526_v6 = vpop.xlane.xlu0 %525  ;;  %v530_v11 = vpop.xlane.xlu1 %529 }
 0x14b   : > { %1380 = vrsqrt.f32 %v611_v32  ;;  %v583_v43 = vmul.f32 0.0051020407, %v526_v6  ;;  %v584_v61 = vmul.f32 0.0051020407, %v530_v11  ;;  %v597_v6 = vld [vmem:[%s1896_s11 + $0x20] sm:$0xff] }
 0x14c   : > { %1382 = vrsqrt.f32 %v612_v34  ;;  %v598_v34 = vld [vmem:[%s1896_s11 + $0x28] sm:$0xff] }
 0x14d   : > { %v1375_v10 = vpop.eup %1374  ;;  %v613_v36 = vadd.f32 1e-05, %v583_v43  ;;  %v614_v39 = vadd.f32 1e-05, %v584_v61 }
 0x14e   : > { %v534_v30 = vpop.xlane.xlu0 %533  ;;  %v638_v49 = vmul.f32 %v1375_v10, %v593_v41  ;;  %v538_v15 = vpop.xlane.xlu1 %537 }
 0x14f   : > { %v585_v62 = vmul.f32 0.0051020407, %v534_v30  ;;  %1384 = vrsqrt.f32 %v613_v36  ;;  %v586_v47 = vmul.f32 0.0051020407, %v538_v15  ;;  %v602_v36 = vld [vmem:[%s1896_s11 + $0x48] sm:$0xff] }
 0x150   : > { %700 = vperm.xlu0 %1372, %v638_v49  }
 0x151   : > { %v1377_v59 = vpop.eup %1376  ;;  %v615_v22 = vadd.f32 1e-05, %v585_v62  ;;  %v616_v10 = vadd.f32 1e-05, %v586_v47 }
 0x152   : > { %v542_v20 = vpop.xlane.xlu0 %541  ;;  %v639_v42 = vmul.f32 %v1377_v59, %v594_v31  ;;  %v1379_v38 = vpop.eup %1378 }
 0x153   : > { %v587_v54 = vmul.f32 0.0051020407, %v542_v20  ;;  %v640_v50 = vmul.f32 %v1379_v38, %v595_v13  ;;  %v546_v46 = vpop.xlane.xlu1 %545 }
 0x154   : > { %705 = vperm.xlu1 %1373, %v639_v42   ;;  %v588_v11 = vmul.f32 0.0051020407, %v546_v46  ;;  %v604_v42 = vld [vmem:[%s1896_s11 + $0x58] sm:$0xff] }
 0x155   : > { %v617_v57 = vadd.f32 1e-05, %v587_v54  ;;  %v1381_v44 = vpop.eup %1380  ;;  %v599_v54 = vld [vmem:[%s1896_s11 + $0x30] sm:$0xff] }
 0x156   : > { %v550_v19 = vpop.xlane.xlu0 %549  ;;  %v641_v52 = vmul.f32 %v1381_v44, %v596_v1  ;;  %v1383_v37 = vpop.eup %1382  ;;  %v618_v61 = vadd.f32 1e-05, %v588_v11  ;;  %v600_v44 = vld [vmem:[%s1896_s11 + $0x38] sm:$0xff]  ;;  %v606_v1 = vld [vmem:[%s1896_s11 + $0x68] sm:$0xff] }
 0x157   : > { %v589_v25 = vmul.f32 0.0051020407, %v550_v19  ;;  %1386 = vrsqrt.f32 %v617_v57  ;;  %v554_v30 = vpop.xlane.xlu1 %553  ;;  %v642_v49 = vmul.f32 %v1383_v37, %v597_v6 }
 0x158   : > { %710 = vperm.xlu1 %1373, %v640_v50   ;;  %1388 = vrsqrt.f32 %v614_v39  ;;  %v590_v20 = vmul.f32 0.0051020407, %v554_v30 }
 0x159   : > { %v619_v28 = vadd.f32 1e-05, %v589_v25  ;;  %1390 = vrsqrt.f32 %v615_v22  ;;  %v1385_v43 = vpop.eup %1384 }
 0x15a   : > { %v558_v23 = vpop.xlane.xlu0 %557  ;;  %v643_v31 = vmul.f32 %v1385_v43, %v598_v34  ;;  %v620_v57 = vadd.f32 1e-05, %v590_v20 }
 0x15b   : > { %v591_v32 = vmul.f32 0.0051020407, %v558_v23  ;;  %1392 = vrsqrt.f32 %v619_v28  ;;  %v601_v28 = vld [vmem:[%s1896_s11 + $0x40] sm:$0xff] }
 0x15c   : > { %715 = vperm.xlu1 %1373, %v641_v52   ;;  %v667_v52 = vld [vmem:[%s1865_s8 + $0x70] sm:$0xff] }
 0x15d   : > { %v621_v41 = vadd.f32 1e-05, %v591_v32  ;;  %v603_v32 = vld [vmem:[%s1896_s11 + $0x50] sm:$0xff] }
 0x15f   : > { %1394 = vrsqrt.f32 %v621_v41  ;;  %v605_v41 = vld [vmem:[%s1896_s11 + $0x60] sm:$0xff] }
 0x160   : > { %720 = vperm.xlu1 %1373, %v642_v49   ;;  %1396 = vrsqrt.f32 %v616_v10  ;;  %v841_v10 = vpop.permute.xlu1 %840 }
 0x161   : > { %v1387_v59 = vpop.eup %1386  ;;  %1398 = vrsqrt.f32 %v618_v61  ;;  %v666_v61 = vld [vmem:[%s1865_s8 + $0x68] sm:$0xff] }
 0x162   : > { %v647_v15 = vmul.f32 %v1387_v59, %v602_v36  ;;  %v1389_v62 = vpop.eup %1388  ;;  %1400 = vrsqrt.f32 %v620_v57  ;;  %v607_v36 = vld [vmem:[%s1896_s11 + $0x70] sm:$0xff]  ;;  %v836_v20 = vpop.permute.xlu0 %835 }
 0x163   : > { %v1391_v38 = vpop.eup %1390  ;;  %v644_v39 = vmul.f32 %v1389_v62, %v599_v54 }
 0x164   : > { %725 = vperm.xlu1 %1373, %v643_v31   ;;  %745 = vperm.xlu0 %1372, %v647_v15   ;;  %v645_v25 = vmul.f32 %v1391_v38, %v600_v44  ;;  %v1913_v11 = vpop.permute.xlu1 %850 }
 0x165   : > { %v1393_v13 = vpop.eup %1392 }
 0x166   : > { %v649_v19 = vmul.f32 %v1393_v13, %v604_v42  ;;  %v846_v15 = vpop.permute.xlu0 %845 }
 0x168   : > { %730 = vperm.xlu1 %1373, %v644_v39   ;;  %755 = vperm.xlu0 %1372, %v649_v19   ;;  %v668_v19 = vld [vmem:[%s1938_s14] sm:$0xff] }
 0x169   : > { %v1395_v22 = vpop.eup %1394 }
 0x16a   : > { %v651_v50 = vmul.f32 %v1395_v22, %v606_v1  ;;  %v1397_v46 = vpop.eup %1396  ;;  %v1917_v62 = vpop.permute.xlu0 %855  ;;  %v669_v1 = vld [vmem:[%s1938_s14 + $0x8] sm:$0xff] }
 0x16b   : > { %v646_v47 = vmul.f32 %v1397_v46, %v601_v28  ;;  %v1399_v23 = vpop.eup %1398 }
 0x16c   : > { %735 = vperm.xlu1 %1373, %v645_v25   ;;  %765 = vperm.xlu0 %1372, %v651_v50   ;;  %v648_v37 = vmul.f32 %v1399_v23, %v603_v32  ;;  %v1401_v6 = vpop.eup %1400  ;;  %v670_v32 = vld [vmem:[%s1938_s14 + $0x10] sm:$0xff] }
 0x16d   : > { %v650_v43 = vmul.f32 %v1401_v6, %v605_v41 }
 0x16e   : > { %v1919_v54 = vpop.permute.xlu0 %865 }
 0x170   : > { %740 = vperm.xlu1 %1373, %v646_v47   ;;  %905 = vperm.xlu0 %1372, %v667_v52  }
 0x172   : > { %v1921_v42 = vpop.permute.xlu0 %875 }
 0x174   : > { %750 = vperm.xlu1 %1373, %v648_v37   ;;  %v671_v37 = vld [vmem:[%s1938_s14 + $0x18] sm:$0xff] }
 0x176   : > { %v1925_v13 = vpop.permute.xlu0 %885 }
 0x178   : > { %760 = vperm.xlu1 %1373, %v650_v43  }
 0x17a   : > { %v1929_v44 = vpop.permute.xlu0 %895 }
 0x18f   : > { %v562_v34 = vpop.xlane.xlu1 %561 }
 0x190   : > { %v592_v30 = vmul.f32 0.0051020407, %v562_v34 }
 0x192   : > { %v622_v49 = vadd.f32 1e-05, %v592_v30 }
 0x193   : > { %v1923_v38 = vpop.permute.xlu1 %860 }
 0x194   : > { %1402 = vrsqrt.f32 %v622_v49 }
 0x197   : > { %v1927_v57 = vpop.permute.xlu1 %870 }
 0x19b   : > { %v1931_v39 = vpop.permute.xlu1 %880 }
 0x19e   : > { %v1403_v31 = vpop.eup %1402 }
 0x19f   : > { %v652_v59 = vmul.f32 %v1403_v31, %v607_v36  ;;  %v1943_v25 = vpop.permute.xlu1 %890  ;;  %v673_v36 = vld [vmem:[%s1938_s14 + $0x28] sm:$0xff] }
 0x1a1   : > { %770 = vperm.xlu1 %1373, %v652_v59  }
 0x1a5   : > { %900 = vperm.xlu1 %1373, %v666_v61  }
 0x1cf   : > { %v701_v22 = vpop.permute.xlu0 %700 }
 0x1d0   : > { %v773_v50 = vmul.f32 %v701_v22, %v1702_v7  ;;  %v774_v46 = vmul.f32 %v701_v22, %v1705_v8  ;;  %v672_v8 = vld [vmem:[%s1938_s14 + $0x20] sm:$0xff] }
 0x1d2   : > { %v803_v28 = vadd.f32 %v773_v50, %v668_v19  ;;  %v804_v52 = vadd.f32 %v774_v46, %v669_v1  ;;  %v674_v50 = vld [vmem:[%s1938_s14 + $0x30] sm:$0xff]  ;;  %v675_v46 = vld [vmem:[%s1938_s14 + $0x38] sm:$0xff] }
 0x1d3   : > { %v706_v6 = vpop.permute.xlu1 %705 }
 0x1d4   : > { %v908_v47 = vadd.f32 %v836_v20, %v803_v28  ;;  %v909_v23 = vadd.f32 %v836_v20, %v804_v52  ;;  %v775_v41 = vmul.f32 %v706_v6, %v1722_v24  ;;  %v776_v43 = vmul.f32 %v706_v6, %v1725_v4  ;;  %v676_v6 = vld [vmem:[%s1938_s14 + $0x40] sm:$0xff] }
 0x1d6   : > { %v938_v34 = vmax.f32 %v908_v47, 0.0  ;;  %v939_v30 = vmax.f32 %v909_v23, 0.0  ;;  %v805_v49 = vadd.f32 %v775_v41, %v670_v32  ;;  %v806_v7 = vadd.f32 %v776_v43, %v671_v37  ;;  %v677_v41 = vld [vmem:[%s1938_s14 + $0x48] sm:$0xff] }
 0x1d7   : > { %v711_v24 = vpop.permute.xlu1 %710 }
 0x1d8   : > { %968 = vst [vmem:[%s1951_s15] sm:$0xff] %v938_v34  ;;  %969 = vst.msk [vmem:[%s1951_s15 + $0x8] sm:$0xff] %vm352_vm0, %v939_v30  ;;  %v910_v31 = vadd.f32 %v841_v10, %v805_v49  ;;  %v911_v4 = vadd.f32 %v841_v10, %v806_v7  ;;  %v777_v59 = vmul.f32 %v711_v24, %v1708_v9 }
 0x1d9   : > { %v778_v61 = vmul.f32 %v711_v24, %v1711_v12  ;;  %v679_v24 = vld [vmem:[%s1938_s14 + $0x58] sm:$0xff] }
 0x1da   : > { %v940_v20 = vmax.f32 %v910_v31, 0.0  ;;  %v941_v19 = vmax.f32 %v911_v4, 0.0  ;;  %v807_v1 = vadd.f32 %v777_v59, %v672_v8 }
 0x1db   : > { %v808_v22 = vadd.f32 %v778_v61, %v673_v36  ;;  %v716_v28 = vpop.permute.xlu1 %715  ;;  %v678_v36 = vld [vmem:[%s1938_s14 + $0x50] sm:$0xff] }
 0x1dc   : > { %970 = vst [vmem:[%s1951_s15 + $0x10] sm:$0xff] %v940_v20  ;;  %971 = vst.msk [vmem:[%s1951_s15 + $0x18] sm:$0xff] %vm352_vm0, %v941_v19  ;;  %v912_v52 = vadd.f32 %v846_v15, %v807_v1  ;;  %v779_v9 = vmul.f32 %v716_v28, %v1729_v27  ;;  %v780_v12 = vmul.f32 %v716_v28, %v1732_v29  ;;  %v686_v61 = vld [vmem:[%s1938_s14 + $0x90] sm:$0xff]  ;;  %v687_v20 = vld [vmem:[%s1938_s14 + $0x98] sm:$0xff] }
 0x1dd   : > { %v913_v10 = vadd.f32 %v846_v15, %v808_v22 }
 0x1de   : > { %v942_v47 = vmax.f32 %v912_v52, 0.0  ;;  %v809_v32 = vadd.f32 %v779_v9, %v674_v50  ;;  %v810_v37 = vadd.f32 %v780_v12, %v675_v46 }
 0x1df   : > { %v943_v23 = vmax.f32 %v913_v10, 0.0  ;;  %v721_v43 = vpop.permute.xlu1 %720  ;;  %v680_v10 = vld [vmem:[%s1938_s14 + $0x60] sm:$0xff] }
 0x1e0   : > { %972 = vst [vmem:[%s1951_s15 + $0x20] sm:$0xff] %v942_v47  ;;  %v914_v15 = vadd.f32 %v1913_v11, %v809_v32  ;;  %v915_v27 = vadd.f32 %v1913_v11, %v810_v37  ;;  %v781_v29 = vmul.f32 %v721_v43, %v1744_v45  ;;  %v782_v34 = vmul.f32 %v721_v43, %v1747_v48  ;;  %v691_v32 = vld [vmem:[%s1938_s14 + $0xb8] sm:$0xff] }
 0x1e1   : > { %973 = vst.msk [vmem:[%s1951_s15 + $0x28] sm:$0xff] %vm352_vm0, %v943_v23  ;;  %v690_v23 = vld [vmem:[%s1938_s14 + $0xb0] sm:$0xff] }
 0x1e2   : > { %v944_v30 = vmax.f32 %v914_v15, 0.0  ;;  %v945_v49 = vmax.f32 %v915_v27, 0.0  ;;  %v811_v7 = vadd.f32 %v781_v29, %v676_v6  ;;  %v812_v8 = vadd.f32 %v782_v34, %v677_v41 }
 0x1e3   : > { %v726_v31 = vpop.permute.xlu1 %725  ;;  %v746_v4 = vpop.permute.xlu0 %745 }
 0x1e4   : > { %974 = vst [vmem:[%s1951_s15 + $0x30] sm:$0xff] %v944_v30  ;;  %975 = vst.msk [vmem:[%s1951_s15 + $0x38] sm:$0xff] %vm352_vm0, %v945_v49  ;;  %v916_v11 = vadd.f32 %v1917_v62, %v811_v7  ;;  %v917_v45 = vadd.f32 %v1917_v62, %v812_v8  ;;  %v783_v48 = vmul.f32 %v726_v31, %v1751_v51  ;;  %v681_v51 = vld [vmem:[%s1938_s14 + $0x68] sm:$0xff]  ;;  %v682_v49 = vld [vmem:[%s1938_s14 + $0x70] sm:$0xff] }
 0x1e5   : > { %v784_v59 = vmul.f32 %v726_v31, %v1754_v53  ;;  %v791_v19 = vmul.f32 %v746_v4, %v1795_v40  ;;  %v792_v1 = vmul.f32 %v746_v4, %v1798_v5  ;;  %v683_v7 = vld [vmem:[%s1938_s14 + $0x78] sm:$0xff] }
 0x1e6   : > { %v946_v22 = vmax.f32 %v916_v11, 0.0  ;;  %v947_v50 = vmax.f32 %v917_v45, 0.0  ;;  %v813_v46 = vadd.f32 %v783_v48, %v678_v36 }
 0x1e7   : > { %v814_v28 = vadd.f32 %v784_v59, %v679_v24  ;;  %v821_v52 = vadd.f32 %v791_v19, %v686_v61  ;;  %v822_v62 = vadd.f32 %v792_v1, %v687_v20  ;;  %v731_v9 = vpop.permute.xlu1 %730  ;;  %v756_v12 = vpop.permute.xlu0 %755  ;;  %v685_v61 = vld [vmem:[%s1938_s14 + $0x88] sm:$0xff] }
 0x1e8   : > { %976 = vst [vmem:[%s1951_s15 + $0x40] sm:$0xff] %v946_v22  ;;  %977 = vst.msk [vmem:[%s1951_s15 + $0x48] sm:$0xff] %vm352_vm0, %v947_v50  ;;  %v918_v53 = vadd.f32 %v1923_v38, %v813_v46  ;;  %v785_v5 = vmul.f32 %v731_v9, %v1766_v63  ;;  %v786_v47 = vmul.f32 %v731_v9, %v1769_v3 }
 0x1e9   : > { %v919_v40 = vadd.f32 %v1923_v38, %v814_v28  ;;  %v926_v37 = vadd.f32 %v1931_v39, %v821_v52  ;;  %v927_v6 = vadd.f32 %v1931_v39, %v822_v62  ;;  %v795_v41 = vmul.f32 %v756_v12, %v1817_v60  ;;  %v688_v52 = vld [vmem:[%s1938_s14 + $0xa0] sm:$0xff]  ;;  %v689_v62 = vld [vmem:[%s1938_s14 + $0xa8] sm:$0xff] }
 0x1ea   : > { %v796_v43 = vmul.f32 %v756_v12, %v1820_v18  ;;  %v948_v15 = vmax.f32 %v918_v53, 0.0  ;;  %v815_v63 = vadd.f32 %v785_v5, %v680_v10  ;;  %v816_v27 = vadd.f32 %v786_v47, %v681_v51  ;;  %v692_v5 = vld [vmem:[%s1938_s14 + $0xc0] sm:$0xff]  ;;  %v693_v47 = vld [vmem:[%s1938_s14 + $0xc8] sm:$0xff] }
 0x1eb   : > { %v949_v38 = vmax.f32 %v919_v40, 0.0  ;;  %v956_v3 = vmax.f32 %v926_v37, 0.0  ;;  %v957_v29 = vmax.f32 %v927_v6, 0.0  ;;  %v825_v34 = vadd.f32 %v795_v41, %v690_v23  ;;  %v736_v8 = vpop.permute.xlu1 %735 }
 0x1ec   : > { %v826_v30 = vadd.f32 %v796_v43, %v691_v32  ;;  %978 = vst [vmem:[%s1951_s15 + $0x50] sm:$0xff] %v948_v15  ;;  %v920_v60 = vadd.f32 %v1919_v54, %v815_v63  ;;  %v921_v18 = vadd.f32 %v1919_v54, %v816_v27  ;;  %v787_v39 = vmul.f32 %v736_v8, %v1773_v16  ;;  %v684_v16 = vld [vmem:[%s1938_s14 + $0x80] sm:$0xff] }
 0x1ed   : > { %979 = vst.msk [vmem:[%s1951_s15 + $0x58] sm:$0xff] %vm352_vm0, %v949_v38  ;;  %v788_v36 = vmul.f32 %v736_v8, %v1776_v17  ;;  %986 = vst [vmem:[%s1951_s15 + $0x90] sm:$0xff] %v956_v3  ;;  %v930_v24 = vadd.f32 %v1943_v25, %v825_v34  ;;  %v694_v3 = vld [vmem:[%s1938_s14 + $0xd0] sm:$0xff]  ;;  %v697_v34 = vld [vmem:[%s1938_s14 + $0xe8] sm:$0xff] }
 0x1ee   : > { %987 = vst.msk [vmem:[%s1951_s15 + $0x98] sm:$0xff] %vm352_vm0, %v957_v29  ;;  %v931_v31 = vadd.f32 %v1943_v25, %v826_v30  ;;  %v950_v4 = vmax.f32 %v920_v60, 0.0  ;;  %v951_v11 = vmax.f32 %v921_v18, 0.0  ;;  %v817_v45 = vadd.f32 %v787_v39, %v682_v49  ;;  %v696_v29 = vld [vmem:[%s1938_s14 + $0xe0] sm:$0xff]  ;;  %v695_v49 = vld [vmem:[%s1938_s14 + $0xd8] sm:$0xff] }
 0x1ef   : > { %v818_v48 = vadd.f32 %v788_v36, %v683_v7  ;;  %v960_v54 = vmax.f32 %v930_v24, 0.0  ;;  %v741_v17 = vpop.permute.xlu1 %740 }
 0x1f0   : > { %v961_v59 = vmax.f32 %v931_v31, 0.0  ;;  %980 = vst [vmem:[%s1951_s15 + $0x60] sm:$0xff] %v950_v4  ;;  %981 = vst.msk [vmem:[%s1951_s15 + $0x68] sm:$0xff] %vm352_vm0, %v951_v11  ;;  %v922_v25 = vadd.f32 %v1927_v57, %v817_v45  ;;  %v789_v19 = vmul.f32 %v741_v17, %v1788_v33  ;;  %v790_v1 = vmul.f32 %v741_v17, %v1791_v35 }
 0x1f1   : > { %v923_v20 = vadd.f32 %v1927_v57, %v818_v48  ;;  %990 = vst [vmem:[%s1951_s15 + $0xb0] sm:$0xff] %v960_v54 }
 0x1f2   : > { %991 = vst.msk [vmem:[%s1951_s15 + $0xb8] sm:$0xff] %vm352_vm0, %v961_v59  ;;  %v952_v22 = vmax.f32 %v922_v25, 0.0  ;;  %v819_v46 = vadd.f32 %v789_v19, %v684_v16  ;;  %v820_v28 = vadd.f32 %v790_v1, %v685_v61 }
 0x1f3   : > { %v953_v50 = vmax.f32 %v923_v20, 0.0  ;;  %v751_v10 = vpop.permute.xlu1 %750 }
 0x1f4   : > { %982 = vst [vmem:[%s1951_s15 + $0x70] sm:$0xff] %v952_v22  ;;  %v924_v33 = vadd.f32 %v1921_v42, %v819_v46  ;;  %v925_v35 = vadd.f32 %v1921_v42, %v820_v28  ;;  %v793_v57 = vmul.f32 %v751_v10, %v1810_v56  ;;  %v794_v51 = vmul.f32 %v751_v10, %v1813_v58 }
 0x1f5   : > { %983 = vst.msk [vmem:[%s1951_s15 + $0x78] sm:$0xff] %vm352_vm0, %v953_v50 }
 0x1f6   : > { %v954_v9 = vmax.f32 %v924_v33, 0.0  ;;  %v955_v12 = vmax.f32 %v925_v35, 0.0  ;;  %v823_v53 = vadd.f32 %v793_v57, %v688_v52  ;;  %v824_v40 = vadd.f32 %v794_v51, %v689_v62 }
 0x1f7   : > { %v761_v23 = vpop.permute.xlu1 %760 }
 0x1f8   : > { %984 = vst [vmem:[%s1951_s15 + $0x80] sm:$0xff] %v954_v9  ;;  %985 = vst.msk [vmem:[%s1951_s15 + $0x88] sm:$0xff] %vm352_vm0, %v955_v12  ;;  %v928_v42 = vadd.f32 %v1925_v13, %v823_v53  ;;  %v929_v56 = vadd.f32 %v1925_v13, %v824_v40  ;;  %v797_v58 = vmul.f32 %v761_v23, %v1832_v21  ;;  %v766_v21 = vpop.permute.xlu0 %765 }
 0x1f9   : > { %v798_v32 = vmul.f32 %v761_v23, %v1835_v0  ;;  %v799_v0 = vmul.f32 %v766_v21, %v1839_v2  ;;  %v800_v27 = vmul.f32 %v766_v21, %v1842_v26 }
 0x1fa   : > { %v958_v37 = vmax.f32 %v928_v42, 0.0  ;;  %v959_v6 = vmax.f32 %v929_v56, 0.0  ;;  %v827_v41 = vadd.f32 %v797_v58, %v692_v5 }
 0x1fb   : > { %v828_v43 = vadd.f32 %v798_v32, %v693_v47  ;;  %v829_v18 = vadd.f32 %v799_v0, %v694_v3  ;;  %v830_v39 = vadd.f32 %v800_v27, %v695_v49 }
 0x1fc   : > { %988 = vst [vmem:[%s1951_s15 + $0xa0] sm:$0xff] %v958_v37  ;;  %989 = vst.msk [vmem:[%s1951_s15 + $0xa8] sm:$0xff] %vm352_vm0, %v959_v6  ;;  %v932_v15 = vadd.f32 %v1929_v44, %v827_v41  ;;  %v906_v2 = vpop.permute.xlu0 %905 }
 0x1fd   : > { %v933_v38 = vadd.f32 %v1929_v44, %v828_v43 }
 0x1fe   : > { %v962_v13 = vmax.f32 %v932_v15, 0.0 }
 0x1ff   : > { %v963_v63 = vmax.f32 %v933_v38, 0.0 }
 0x200   : > { %992 = vst [vmem:[%s1951_s15 + $0xc0] sm:$0xff] %v962_v13 }
 0x201   : > { %993 = vst.msk [vmem:[%s1951_s15 + $0xc8] sm:$0xff] %vm352_vm0, %v963_v63 }
 0x220   : > { %v771_v30 = vpop.permute.xlu1 %770 }
 0x221   : > { %v801_v7 = vmul.f32 %v771_v30, %v1879_v14  ;;  %v802_v44 = vmul.f32 %v771_v30, %v1875_v55 }
 0x223   : > { %v831_v8 = vadd.f32 %v801_v7, %v696_v29  ;;  %v832_v60 = vadd.f32 %v802_v44, %v697_v34 }
 0x224   : > { %v901_v36 = vpop.permute.xlu1 %900  ;;  %1004 = sbr.rel (!%p1547_p4) target bundleno = 622 (0x26e), region = 40 }
 0x225   : > { %v936_v26 = vadd.f32 %v906_v2, %v831_v8  ;;  %v937_v24 = vadd.f32 %v906_v2, %v832_v60  ;;  %v934_v31 = vadd.f32 %v901_v36, %v829_v18  ;;  %v935_v4 = vadd.f32 %v901_v36, %v830_v39 }
 0x227   : > { %v966_v11 = vmax.f32 %v936_v26, 0.0  ;;  %v967_v45 = vmax.f32 %v937_v24, 0.0  ;;  %v964_v48 = vmax.f32 %v934_v31, 0.0  ;;  %v965_v14 = vmax.f32 %v935_v4, 0.0 }
 0x229   : > { %996 = vst [vmem:[%s1951_s15 + $0xe0] sm:$0xff] %v966_v11  ;;  %997 = vst.msk [vmem:[%s1951_s15 + $0xe8] sm:$0xff] %vm352_vm0, %v967_v45 }
 0x22a   : > { %994 = vst [vmem:[%s1951_s15 + $0xd0] sm:$0xff] %v964_v48  ;;  %995 = vst.msk [vmem:[%s1951_s15 + $0xd8] sm:$0xff] %vm352_vm0, %v965_v14 }
 0x22b   : > { %s2220_s21 = smov (!%p1007_p9, %s1006_s21), 15 }
 0x22c   : > { %s1277_s29 = sshll.u32 %s2220_s21, 8 }
 0x22d   : > { %p1266_p10 = scmp.eq.s32.totalorder %s1277_s29, 0 }
 0x22e   : > { %1404 = sdivrem.u32 (!%p1266_p10), %s2220_s21, 15 }
 0x22f   : > { %1017 = sbr.rel (%p1266_p10) target bundleno = 622 (0x26e), region = 44 }
 0x237   : > { %s2083_s23 = spop.drf %1404 }
 0x238   : > { %p1267_p11 = scmp.le.s32.totalorder %s2083_s23, 0 }
 0x239   : > { %s2211_s18 = smov (!%p1267_p11), %s2077_s28  ;;  %s2212_s24 = smov (!%p1267_p11), %s1951_s15 }
 0x23a   : > { %1189 = sbr.rel (%p1267_p11) target bundleno = 593 (0x251), region = 101  ;;  %s2092_s30 = smov (!%p1267_p11), 0  }
 0x23b   : > { %s2094_s5 = smov (!%p1267_p11), 0  }
 0x241 LB: >> { %v1031_v55 = vld [vmem:[%s1470_s24] sm:$0xff]  ;;  %v1033_v54 = vld [vmem:[%s1470_s24 + $0x10] sm:$0xff]  ;;  %s1091_s6 = sadd.s32 1, %s1474_s30  ;;  %v1061_v62 = vld [vmem:[%s1470_s24 + $0x8] sm:$0xff]  ;;  %s1025_s5 = sadd.s32 1, %s1478_s5   ;;  %s1478_s5 = sphi %s2094_s5, %s1025_s5   ;;  %s1474_s30 = sphi %s2092_s30, %s2215_s30   ;;  %s1470_s24 = sphi %s2212_s24, %s2214_s24   ;;  %s1466_s18 = sphi %s2211_s18, %s2213_s18  }
 0x242   : >> { %v1035_v59 = vld [vmem:[%s1470_s24 + $0x20] sm:$0xff]  ;;  %1032 = vst [vmem:[%s1466_s18] sm:$0xff] %v1031_v55  ;;  %1034 = vst [vmem:[%s1466_s18 + $0x10] sm:$0xff] %v1033_v54  ;;  %v1037_v16 = vld [vmem:[%s1470_s24 + $0x30] sm:$0xff]  ;;  %p1092_p12 = scmp.ge.s32.totalorder %s1091_s6, %s2083_s23  ;;  %p1024_p13 = scmp.ge.s32.totalorder %s1025_s5, %s2083_s23 }
 0x243   : >> { %1036 = vst [vmem:[%s1466_s18 + $0x20] sm:$0xff] %v1035_v59  ;;  %v1039_v61 = vld [vmem:[%s1470_s24 + $0x40] sm:$0xff]  ;;  %v1041_v17 = vld [vmem:[%s1470_s24 + $0x50] sm:$0xff]  ;;  %1038 = vst [vmem:[%s1466_s18 + $0x30] sm:$0xff] %v1037_v16 }
 0x244   : >> { %1040 = vst [vmem:[%s1466_s18 + $0x40] sm:$0xff] %v1039_v61  ;;  %1042 = vst [vmem:[%s1466_s18 + $0x50] sm:$0xff] %v1041_v17  ;;  %v1043_v25 = vld [vmem:[%s1470_s24 + $0x60] sm:$0xff]  ;;  %v1045_v20 = vld [vmem:[%s1470_s24 + $0x70] sm:$0xff]  ;;  %s2222_s6 = smov (%p1092_p12, %s1091_s6), 0 }
 0x245   : >> { %v1047_v19 = vld [vmem:[%s1470_s24 + $0x80] sm:$0xff]  ;;  %1044 = vst [vmem:[%s1466_s18 + $0x60] sm:$0xff] %v1043_v25  ;;  %1046 = vst [vmem:[%s1466_s18 + $0x70] sm:$0xff] %v1045_v20  ;;  %v1049_v1 = vld [vmem:[%s1470_s24 + $0x90] sm:$0xff]  ;;  %s1094_s7 = smul.u32 240, %s2222_s6  ;;  %s2215_s30 = smov %s2222_s6 }
 0x246   : >> { %1048 = vst [vmem:[%s1466_s18 + $0x80] sm:$0xff] %v1047_v19  ;;  %v1051_v22 = vld [vmem:[%s1470_s24 + $0xa0] sm:$0xff]  ;;  %v1053_v50 = vld [vmem:[%s1470_s24 + $0xb0] sm:$0xff]  ;;  %1050 = vst [vmem:[%s1466_s18 + $0x90] sm:$0xff] %v1049_v1 }
 0x247   : >> { %1052 = vst [vmem:[%s1466_s18 + $0xa0] sm:$0xff] %v1051_v22  ;;  %1054 = vst [vmem:[%s1466_s18 + $0xb0] sm:$0xff] %v1053_v50  ;;  %v1055_v46 = vld [vmem:[%s1470_s24 + $0xc0] sm:$0xff]  ;;  %v1057_v28 = vld [vmem:[%s1470_s24 + $0xd0] sm:$0xff]  ;;  %s1096_s8 = scalar_lea.vmem %s1951_s15, %s1094_s7 [#allocation2]   ;;  %s1097_s9 = scalar_lea.vmem %s2077_s28, %s1094_s7  }
 0x248   : >> { %v1059_v52 = vld [vmem:[%s1470_s24 + $0xe0] sm:$0xff]  ;;  %1056 = vst [vmem:[%s1466_s18 + $0xc0] sm:$0xff] %v1055_v46  ;;  %1058 = vst [vmem:[%s1466_s18 + $0xd0] sm:$0xff] %v1057_v28  ;;  %v1063_v10 = vld [vmem:[%s1470_s24 + $0x18] sm:$0xff] }
 0x249   : >> { %1060 = vst [vmem:[%s1466_s18 + $0xe0] sm:$0xff] %v1059_v52  ;;  %v1065_v33 = vld [vmem:[%s1470_s24 + $0x28] sm:$0xff]  ;;  %1062 = vst [vmem:[%s1466_s18 + $0x8] sm:$0xff] %v1061_v62  ;;  %v1067_v35 = vld [vmem:[%s1470_s24 + $0x38] sm:$0xff] }
 0x24a   : >> { %1064 = vst [vmem:[%s1466_s18 + $0x18] sm:$0xff] %v1063_v10  ;;  %1066 = vst [vmem:[%s1466_s18 + $0x28] sm:$0xff] %v1065_v33  ;;  %v1069_v57 = vld [vmem:[%s1470_s24 + $0x48] sm:$0xff]  ;;  %v1071_v51 = vld [vmem:[%s1470_s24 + $0x58] sm:$0xff]  ;;  %1027 = sbr.rel (!%p1024_p13) target bundleno = 577 (0x241), region = 107 }
 0x24b   : >> { %1068 = vst [vmem:[%s1466_s18 + $0x38] sm:$0xff] %v1067_v35  ;;  %1070 = vst [vmem:[%s1466_s18 + $0x48] sm:$0xff] %v1069_v57  ;;  %v1073_v9 = vld [vmem:[%s1470_s24 + $0x68] sm:$0xff]  ;;  %v1075_v12 = vld [vmem:[%s1470_s24 + $0x78] sm:$0xff] }
 0x24c   : >> { %1072 = vst [vmem:[%s1466_s18 + $0x58] sm:$0xff] %v1071_v51  ;;  %v1077_v53 = vld [vmem:[%s1470_s24 + $0x88] sm:$0xff]  ;;  %1074 = vst [vmem:[%s1466_s18 + $0x68] sm:$0xff] %v1073_v9  ;;  %v1079_v40 = vld [vmem:[%s1470_s24 + $0x98] sm:$0xff] }
 0x24d   : >> { %1076 = vst [vmem:[%s1466_s18 + $0x78] sm:$0xff] %v1075_v12  ;;  %1078 = vst [vmem:[%s1466_s18 + $0x88] sm:$0xff] %v1077_v53  ;;  %v1081_v5 = vld [vmem:[%s1470_s24 + $0xa8] sm:$0xff]  ;;  %v1083_v47 = vld [vmem:[%s1470_s24 + $0xb8] sm:$0xff] }
 0x24e   : >> { %1080 = vst [vmem:[%s1466_s18 + $0x98] sm:$0xff] %v1079_v40  ;;  %1082 = vst [vmem:[%s1466_s18 + $0xa8] sm:$0xff] %v1081_v5  ;;  %v1085_v23 = vld [vmem:[%s1470_s24 + $0xc8] sm:$0xff]  ;;  %v1087_v42 = vld [vmem:[%s1470_s24 + $0xd8] sm:$0xff] }
 0x24f   : >> { %1084 = vst [vmem:[%s1466_s18 + $0xb8] sm:$0xff] %v1083_v47  ;;  %v1089_v56 = vld [vmem:[%s1470_s24 + $0xe8] sm:$0xff]  ;;  %1086 = vst [vmem:[%s1466_s18 + $0xc8] sm:$0xff] %v1085_v23  ;;  %s2214_s24 = smov %s1096_s8 }
 0x250   : >> { %1088 = vst [vmem:[%s1466_s18 + $0xd8] sm:$0xff] %v1087_v42  ;;  %1090 = vst [vmem:[%s1466_s18 + $0xe8] sm:$0xff] %v1089_v56  ;;  %s2213_s18 = smov %s1097_s9 }
 0x251 PF: > { %1406 = sdivrem.u32 %s2220_s21, 15 }
 0x252   : > { %s1268_s10 = smul.u32 240, %s2083_s23 }
 0x254   : > { %s2186_s11 = scalar_lea.vmem %s1951_s15, %s1268_s10 [#allocation2]   ;;  %s2189_s12 = scalar_lea.vmem %s2077_s28, %s1268_s10  }
 0x25a   : > { %s1407_s13 = spop.drf %1406 }
 0x25b   : > { %p1270_p0 = scmp.le.s32.totalorder %s1407_s13, 0 }
 0x25c   : > { %s1480_s14 = smov (!%p1270_p0), %s2189_s12   ;;  %s1484_s17 = smov (!%p1270_p0), %s2186_s11  }
 0x25d   : > { %1203 = sbr.rel (%p1270_p0) target bundleno = 622 (0x26e), region = 112  ;;  %s1488_s20 = smov (!%p1270_p0), 0  }
 0x25e   : > { %s1492_s25 = smov (!%p1270_p0), 0  }
 0x264 LB: >> { %v1114_v58 = vld [vmem:[%s1486_s17] sm:$0xff]  ;;  %v1116_v32 = vld [vmem:[%s1486_s17 + $0x8] sm:$0xff]  ;;  %s1118_s15 = sadd.s32 1, %s1490_s20  ;;  %s1108_s25 = sadd.s32 1, %s1494_s25   ;;  %s1494_s25 = sphi %s1492_s25, %s1108_s25   ;;  %s1490_s20 = sphi %s1488_s20, %s1489_s20   ;;  %s1486_s17 = sphi %s1484_s17, %s1123_s17   ;;  %s1482_s14 = sphi %s1480_s14, %s1124_s14  }
 0x265   : >> { %1115 = vst [vmem:[%s1482_s14] sm:$0xff] %v1114_v58  ;;  %1117 = vst [vmem:[%s1482_s14 + $0x8] sm:$0xff] %v1116_v32  ;;  %p1119_p1 = scmp.ge.s32.totalorder %s1118_s15, %s1407_s13  ;;  %p1107_p2 = scmp.ge.s32.totalorder %s1108_s25, %s1407_s13 }
 0x267   : >> { %s2224_s15 = smov (%p1119_p1, %s1118_s15), 0  ;;  %1110 = sbr.rel (!%p1107_p2) target bundleno = 612 (0x264), region = 118 }
 0x268   : >> { %s1271_s21 = sshll.u32 %s2224_s15, 4  ;;  %s1489_s20 = smov %s2224_s15  }
 0x269   : >> { %s1123_s17 = scalar_lea.vmem %s2186_s11, %s1271_s21 [#allocation2]   ;;  %s1124_s14 = scalar_lea.vmem %s2189_s12, %s1271_s21  }
 0x26e PF: > { %p11_p3 = scmp.ge.s32.totalorder %s1537_s19, 4   ;;  %s2216_s15 = smov %s1458_s16 }
 0x26f   : > { %s2217_s16 = smov %s1545_s22  ;;  %s2218_s17 = smov %s1537_s19 }
 0x270   :  { %13 = sbr.rel (!%p11_p3) target bundleno = 2 (0x2), region = 129 }

</bundles_post_ra>
